<compile_context>
chip_gen: v7x
topology: tpu7x:2x2x1
jax: 0.10.0
libtpu: 0.0.40
codegen_flags: <defaults>
</compile_context>

<pallas_src>
import jax
import jax.numpy as jnp
from jax.experimental import pallas as pl
from jax.experimental.pallas import tpu as pltpu

BN_EPS = 1e-5


def mlp_layer_kernel(x_ref, w_ref, gamma_ref, beta_ref, o_ref, acc_ref):
    k = pl.program_id(1)

    # Partial matmul for this (D_out tile, D_in slab); bf16 inputs, f32 accum.
    prod = jnp.dot(x_ref[...], w_ref[...], preferred_element_type=jnp.float32)

    @pl.when(k == 0)
    def _():
        acc_ref[...] = prod

    @pl.when(k > 0)
    def _():
        acc_ref[...] += prod

    # BN + SiLU epilogue once the reduction over D_in is complete.
    @pl.when(k == pl.num_programs(1) - 1)
    def _():
        z = acc_ref[...]
        inv_n = 1.0 / z.shape[0]
        # BatchNorm1d, training mode: batch statistics, biased variance.
        mean = jnp.sum(z, axis=0, keepdims=True) * inv_n
        centered = z - mean
        var = jnp.sum(centered * centered, axis=0, keepdims=True) * inv_n
        # Fold gamma into the inverse std: one (1, TN) row op instead of a
        # second full (N, TN) multiply.
        scale = gamma_ref[...] * jax.lax.rsqrt(var + BN_EPS)
        y = centered * scale + beta_ref[...]
        # SiLU: exp and the approximate reciprocal both live on the EUP slot.
        sig = pl.reciprocal(1.0 + jnp.exp(-y), approx=True)
        o_ref[...] = (y * sig).astype(o_ref.dtype)
        # Dropout(p=0) is the identity.


def _vmem_capacity_bytes():
    try:
        cap = getattr(pltpu.get_tpu_info(), "vmem_capacity_bytes", None)
        if cap:
            return int(cap)
    except Exception:
        pass
    return 64 * 1024 * 1024  # conservative floor: v7x has 64 MiB per TensorCore


def _buffer_bytes(n, tk, tn):
    # Conservative accounting (x assumed double-buffered even when Buffered(1)
    # is applied, so the fallback path always fits too).
    return (
        2 * n * tk * 2      # x slab (bf16), double-buffered
        + 2 * tk * tn * 2   # weight tile (bf16), double-buffered
        + 2 * n * tn * 4    # output tile (f32), double-buffered
        + n * tn * 4        # f32 accumulator scratch
        + 2 * 2 * tn * 4    # gamma + beta rows (f32), double-buffered
    )


def mlp_layer(x, w, b, gamma, beta, *, tn=None, tk=None):
    """Fused Linear -> BatchNorm1d(train) -> SiLU -> Dropout(p=0).

    x: (N, D_in) f32; w: (D_in, D_out); b/gamma/beta: (D_out,).
    `b` is accepted for parity with nn.Linear but is unused: the batch-mean
    subtraction inside BatchNorm cancels it exactly.
    """
    del b  # algebraically cancelled by BatchNorm's batch-mean subtraction
    n, d_in = x.shape
    d_out = w.shape[1]
    assert n > 1, "training-mode BatchNorm1d needs batch size > 1"

    cap = _vmem_capacity_bytes()
    budget = (cap * 3) // 4  # leave headroom for Mosaic internal scratch

    # D_out tile: lane-dense; 256 matches the 256-wide MXU feed on v6e/v7x and
    # keeps >= 2 tiles whenever possible so both v7x TensorCores get work.
    if tn is None:
        tn = next((c for c in (256, 128) if d_out % c == 0 and d_out // c >= 2),
                  d_out)
    # D_in slab: largest divisor whose buffers fit the per-generation budget;
    # tk == d_in keeps the whole reduction in one step (x fetched only once).
    if tk is None:
        tk = d_in
        for cand in (d_in, 1024, 512, 256, 128):
            if cand <= d_in and d_in % cand == 0 and _buffer_bytes(n, cand, tn) <= budget:
                tk = cand
                break

    assert d_out % tn == 0, "D_out must be divisible by the D_out tile size"
    assert d_in % tk == 0, "D_in must be divisible by the D_in slab size"
    k_steps = d_in // tk

    needed = _buffer_bytes(n, tk, tn)
    assert needed <= budget, (
        f"tiles need {needed} B of VMEM but only {budget} B fit this "
        "generation; pass smaller tn/tk")
    vmem_limit = int(min(budget, needed + max(needed, 16 * 1024 * 1024)))

    # Stream matmul operands in bf16 (halves HBM traffic; f32 accumulate).
    x_bf = x.astype(jnp.bfloat16)
    w_bf = w.astype(jnp.bfloat16)
    g2 = gamma.reshape(1, d_out).astype(jnp.float32)
    be2 = beta.reshape(1, d_out).astype(jnp.float32)

    def run(x_spec):
        grid_spec = pltpu.PrefetchScalarGridSpec(
            num_scalar_prefetch=0,
            grid=(d_out // tn, k_steps),  # D_out parallel, D_in reduction last
            in_specs=[
                x_spec,
                pl.BlockSpec((tk, tn), lambda j, k: (k, j)),   # W tile
                # gamma/beta block indices only change when j changes (k is the
                # inner axis), so their tiny DMAs are skipped on most steps.
                pl.BlockSpec((1, tn), lambda j, k: (0, j)),
                pl.BlockSpec((1, tn), lambda j, k: (0, j)),
            ],
            out_specs=pl.BlockSpec((n, tn), lambda j, k: (0, j)),
            scratch_shapes=[pltpu.VMEM((n, tn), jnp.float32)],
        )
        out = pl.pallas_call(
            mlp_layer_kernel,
            out_shape=jax.ShapeDtypeStruct((n, d_out), jnp.float32),
            grid_spec=grid_spec,
            compiler_params=pltpu.CompilerParams(
                dimension_semantics=("parallel", "arbitrary"),
                vmem_limit_bytes=vmem_limit,
            ),
        )(x_bf, w_bf, g2, be2)
        return jax.block_until_ready(out)

    if k_steps == 1:
        # x's block index is constant: one buffer is enough (saves N*TK*2 B of
        # VMEM headroom, most relevant on v7x's 64 MiB VMEM).
        try:
            return run(pl.BlockSpec((n, tk), lambda j, k: (0, k),
                                    pipeline_mode=pl.Buffered(1)))
        except Exception:
            pass  # fall back to default double buffering on older jax builds
    return run(pl.BlockSpec((n, tk), lambda j, k: (0, k)))


def reference(x, w, b, gamma, beta, *, matmul_dtype=jnp.float32):
    """Pure-JAX reference for Linear -> BatchNorm1d(train) -> SiLU -> Dropout(0)."""
    z = jnp.dot(x.astype(matmul_dtype), w.astype(matmul_dtype),
                preferred_element_type=jnp.float32) + b
    mean = jnp.mean(z, axis=0, keepdims=True)
    var = jnp.mean((z - mean) ** 2, axis=0, keepdims=True)
    y = (z - mean) / jnp.sqrt(var + BN_EPS) * gamma + beta
    return y * jax.nn.sigmoid(y)


if __name__ == "__main__":
    def make_case(key, batch, d_in, d_out):
        kx, kw, kb = jax.random.split(key, 3)
        x = jax.random.normal(kx, (batch, d_in), dtype=jnp.float32)
        bound = 1.0 / (d_in ** 0.5)                      # nn.Linear init range
        w = jax.random.uniform(kw, (d_in, d_out), minval=-bound, maxval=bound,
                               dtype=jnp.float32)        # stored as (D_in, D_out)
        b = jax.random.uniform(kb, (d_out,), minval=-bound, maxval=bound,
                               dtype=jnp.float32)
        gamma = jnp.ones((d_out,), dtype=jnp.float32)    # BatchNorm1d init
        beta = jnp.zeros((d_out,), dtype=jnp.float32)
        return x, w, b, gamma, beta

    def check(out, x, w, b, gamma, beta):
        # Tight check against a reference that matches the kernel's bf16
        # matmul, plus a looser check against full-f32 math.
        ref_bf = reference(x, w, b, gamma, beta, matmul_dtype=jnp.bfloat16)
        ref_f32 = reference(x, w, b, gamma, beta, matmul_dtype=jnp.float32)
        assert out.shape == ref_f32.shape and out.dtype == jnp.float32
        assert jnp.allclose(out, ref_bf, atol=1e-2, rtol=1e-2), "mismatch (bf16 ref)"
        assert jnp.allclose(out, ref_f32, atol=5e-2, rtol=5e-2), "mismatch (f32 ref)"

    key = jax.random.PRNGKey(0)
    k1, k2 = jax.random.split(key)

    # Case 1: single K step (x resident & single-buffered), 2 D_out tiles.
    args1 = make_case(k1, 16, 256, 512)
    out1 = mlp_layer(*args1)
    jax.block_until_ready(out1)
    check(out1, *args1)

    # Case 2: K reduction over D_in (2 steps) with explicit tile sizes.
    args2 = make_case(k2, 16, 512, 256)
    out2 = mlp_layer(*args2, tn=128, tk=256)
    jax.block_until_ready(out2)
    check(out2, *args2)

    print("KERNEL_OK")
</pallas_src>

<mosaic_0001>
module attributes {stable_mosaic.version = 11 : i64} {
  func.func @mlp_layer_kernel(%arg0: i32, %arg1: i32, %arg2: memref<16x256xbf16, #tpu.memory_space<vmem>>, %arg3: memref<256x256xbf16, #tpu.memory_space<vmem>>, %arg4: memref<1x256xf32, #tpu.memory_space<vmem>>, %arg5: memref<1x256xf32, #tpu.memory_space<vmem>>, %arg6: memref<16x256xf32, #tpu.memory_space<vmem>>, %arg7: memref<16x256xf32, #tpu.memory_space<vmem>>) attributes {dimension_semantics = [#tpu.dimension_semantics<parallel>, #tpu.dimension_semantics<arbitrary>], iteration_bounds = array<i64: 2, 1>, scalar_prefetch = 0 : i64, scratch_operands = 1 : i64, tpu.core_type = #tpu.core_type<tc>, window_params = [{pipeline_mode = #tpu.pipeline_mode<synchronous>, transform_indices = @transform_0, window_bounds = array<i64: 16, 256>}, {transform_indices = @transform_1, window_bounds = array<i64: 256, 256>}, {transform_indices = @transform_2, window_bounds = array<i64: 1, 256>}, {transform_indices = @transform_3, window_bounds = array<i64: 1, 256>}, {transform_indices = @transform_4, window_bounds = array<i64: 16, 256>}]} {
    %c0 = arith.constant 0 : index
    %c0_0 = arith.constant 0 : index
    %0 = vector.load %arg2[%c0, %c0_0] : memref<16x256xbf16, #tpu.memory_space<vmem>>, vector<16x256xbf16>
    %c0_1 = arith.constant 0 : index
    %c0_2 = arith.constant 0 : index
    %1 = vector.load %arg3[%c0_1, %c0_2] : memref<256x256xbf16, #tpu.memory_space<vmem>>, vector<256x256xbf16>
    %cst = arith.constant dense<0.000000e+00> : vector<16x256xf32>
    %2 = tpu.matmul %0, %1, %cst {dimension_numbers = #tpu.dot_dimension_numbers<[1], [0], [0], [1], [0, 0, 1, 1], [], []>} : vector<16x256xbf16>, vector<256x256xbf16>, vector<16x256xf32> -> vector<16x256xf32>
    %c0_i32 = arith.constant 0 : i32
    %3 = arith.cmpi eq, %arg1, %c0_i32 : i32
    %4 = arith.extui %3 : i1 to i32
    %c0_i32_3 = arith.constant 0 : i32
    %5 = arith.cmpi ne, %4, %c0_i32_3 : i32
    scf.if %5 {
      %c0_8 = arith.constant 0 : index
      %c0_9 = arith.constant 0 : index
      %12 = vector.load %arg7[%c0_8, %c0_9] : memref<16x256xf32, #tpu.memory_space<vmem>>, vector<16x256xf32>
      tpu.vector_store %arg7[%c0_8, %c0_9], %2 {strides = array<i32>} : memref<16x256xf32, #tpu.memory_space<vmem>>, vector<16x256xf32>,
    } else {
    }
    %c0_i32_4 = arith.constant 0 : i32
    %6 = arith.cmpi sgt, %arg1, %c0_i32_4 : i32
    %7 = arith.extui %6 : i1 to i32
    %c0_i32_5 = arith.constant 0 : i32
    %8 = arith.cmpi ne, %7, %c0_i32_5 : i32
    scf.if %8 {
      %c0_8 = arith.constant 0 : index
      %c0_9 = arith.constant 0 : index
      %12 = vector.load %arg7[%c0_8, %c0_9] : memref<16x256xf32, #tpu.memory_space<vmem>>, vector<16x256xf32>
      %13 = arith.addf %12, %2 : vector<16x256xf32>
      %c0_10 = arith.constant 0 : index
      %c0_11 = arith.constant 0 : index
      %14 = vector.load %arg7[%c0_10, %c0_11] : memref<16x256xf32, #tpu.memory_space<vmem>>, vector<16x256xf32>
      tpu.vector_store %arg7[%c0_10, %c0_11], %13 {strides = array<i32>} : memref<16x256xf32, #tpu.memory_space<vmem>>, vector<16x256xf32>,
    } else {
    }
    %c0_i32_6 = arith.constant 0 : i32
    %9 = arith.cmpi eq, %arg1, %c0_i32_6 : i32
    %10 = arith.extui %9 : i1 to i32
    %c0_i32_7 = arith.constant 0 : i32
    %11 = arith.cmpi ne, %10, %c0_i32_7 : i32
    scf.if %11 {
      %c0_8 = arith.constant 0 : index
      %c0_9 = arith.constant 0 : index
      %12 = vector.load %arg7[%c0_8, %c0_9] : memref<16x256xf32, #tpu.memory_space<vmem>>, vector<16x256xf32>
      %cst_10 = arith.constant dense<0.000000e+00> : vector<256xf32>
      %13 = vector.multi_reduction <add>, %12, %cst_10 [0] : vector<16x256xf32> to vector<256xf32>
      %14 = vector.shape_cast %13 : vector<256xf32> to vector<1x256xf32>
      %cst_11 = arith.constant 6.250000e-02 : f32
      %15 = vector.broadcast %cst_11 : f32 to vector<1x256xf32>
      %16 = arith.mulf %14, %15 : vector<1x256xf32>
      %17 = vector.broadcast %16 : vector<1x256xf32> to vector<16x256xf32>
      %18 = arith.subf %12, %17 : vector<16x256xf32>
      %19 = arith.mulf %18, %18 : vector<16x256xf32>
      %cst_12 = arith.constant dense<0.000000e+00> : vector<256xf32>
      %20 = vector.multi_reduction <add>, %19, %cst_12 [0] : vector<16x256xf32> to vector<256xf32>
      %21 = vector.shape_cast %20 : vector<256xf32> to vector<1x256xf32>
      %cst_13 = arith.constant 6.250000e-02 : f32
      %22 = vector.broadcast %cst_13 : f32 to vector<1x256xf32>
      %23 = arith.mulf %21, %22 : vector<1x256xf32>
      %c0_14 = arith.constant 0 : index
      %c0_15 = arith.constant 0 : index
      %24 = vector.load %arg4[%c0_14, %c0_15] : memref<1x256xf32, #tpu.memory_space<vmem>>, vector<1x256xf32>
      %cst_16 = arith.constant 9.99999974E-6 : f32
      %25 = vector.broadcast %cst_16 : f32 to vector<1x256xf32>
      %26 = arith.addf %23, %25 : vector<1x256xf32>
      %27 = math.rsqrt %26 : vector<1x256xf32>
      %28 = arith.mulf %24, %27 : vector<1x256xf32>
      %29 = vector.broadcast %28 : vector<1x256xf32> to vector<16x256xf32>
      %30 = arith.mulf %18, %29 : vector<16x256xf32>
      %c0_17 = arith.constant 0 : index
      %c0_18 = arith.constant 0 : index
      %31 = vector.load %arg5[%c0_17, %c0_18] : memref<1x256xf32, #tpu.memory_space<vmem>>, vector<1x256xf32>
      %32 = vector.broadcast %31 : vector<1x256xf32> to vector<16x256xf32>
      %33 = arith.addf %30, %32 : vector<16x256xf32>
      %cst_19 = arith.constant 0.000000e+00 : f32
      %34 = vector.broadcast %cst_19 : f32 to vector<16x256xf32>
      %35 = arith.subf %34, %33 : vector<16x256xf32>
      %36 = math.exp %35 : vector<16x256xf32>
      %cst_20 = arith.constant 1.000000e+00 : f32
      %37 = vector.broadcast %cst_20 : f32 to vector<16x256xf32>
      %38 = arith.addf %37, %36 : vector<16x256xf32>
      %39 = tpu.reciprocal %38 {approx = true} : vector<16x256xf32> -> vector<16x256xf32>
      %40 = arith.mulf %33, %39 : vector<16x256xf32>
      %c0_21 = arith.constant 0 : index
      %c0_22 = arith.constant 0 : index
      %41 = vector.load %arg6[%c0_21, %c0_22] : memref<16x256xf32, #tpu.memory_space<vmem>>, vector<16x256xf32>
      tpu.vector_store %arg6[%c0_21, %c0_22], %40 {strides = array<i32>} : memref<16x256xf32, #tpu.memory_space<vmem>>, vector<16x256xf32>,
    } else {
    }
    return
  }
  func.func @transform_0(%arg0: i32, %arg1: i32) -> (i32, i32) {
    %c0_i32 = arith.constant 0 : i32
    %c0_i32_0 = arith.constant 0 : i32
    return %c0_i32, %arg1 : i32, i32
  }
  func.func @transform_1(%arg0: i32, %arg1: i32) -> (i32, i32) {
    %c0_i32 = arith.constant 0 : i32
    return %arg1, %arg0 : i32, i32
  }
  func.func @transform_2(%arg0: i32, %arg1: i32) -> (i32, i32) {
    %c0_i32 = arith.constant 0 : i32
    %c0_i32_0 = arith.constant 0 : i32
    return %c0_i32, %arg0 : i32, i32
  }
  func.func @transform_3(%arg0: i32, %arg1: i32) -> (i32, i32) {
    %c0_i32 = arith.constant 0 : i32
    %c0_i32_0 = arith.constant 0 : i32
    return %c0_i32, %arg0 : i32, i32
  }
  func.func @transform_4(%arg0: i32, %arg1: i32) -> (i32, i32) {
    %c0_i32 = arith.constant 0 : i32
    %c0_i32_0 = arith.constant 0 : i32
    return %c0_i32, %arg0 : i32, i32
  }
}

module attributes {stable_mosaic.version = 11 : i64} {
  func.func @mlp_layer_kernel(%arg0: i32, %arg1: i32, %arg2: memref<16x256xbf16, #tpu.memory_space<vmem>>, %arg3: memref<256x256xbf16, #tpu.memory_space<vmem>>, %arg4: memref<1x256xf32, #tpu.memory_space<vmem>>, %arg5: memref<1x256xf32, #tpu.memory_space<vmem>>, %arg6: memref<16x256xf32, #tpu.memory_space<vmem>>, %arg7: memref<16x256xf32, #tpu.memory_space<vmem>>) attributes {dimension_semantics = [#tpu.dimension_semantics<parallel>, #tpu.dimension_semantics<arbitrary>], iteration_bounds = array<i64: 2, 1>, scalar_prefetch = 0 : i64, scratch_operands = 1 : i64, tpu.core_type = #tpu.core_type<tc>, window_params = [{transform_indices = @transform_0, window_bounds = array<i64: 16, 256>}, {transform_indices = @transform_1, window_bounds = array<i64: 256, 256>}, {transform_indices = @transform_2, window_bounds = array<i64: 1, 256>}, {transform_indices = @transform_3, window_bounds = array<i64: 1, 256>}, {transform_indices = @transform_4, window_bounds = array<i64: 16, 256>}]} {
    %c0 = arith.constant 0 : index
    %c0_0 = arith.constant 0 : index
    %0 = vector.load %arg2[%c0, %c0_0] : memref<16x256xbf16, #tpu.memory_space<vmem>>, vector<16x256xbf16>
    %c0_1 = arith.constant 0 : index
    %c0_2 = arith.constant 0 : index
    %1 = vector.load %arg3[%c0_1, %c0_2] : memref<256x256xbf16, #tpu.memory_space<vmem>>, vector<256x256xbf16>
    %cst = arith.constant dense<0.000000e+00> : vector<16x256xf32>
    %2 = tpu.matmul %0, %1, %cst {dimension_numbers = #tpu.dot_dimension_numbers<[1], [0], [0], [1], [0, 0, 1, 1], [], []>} : vector<16x256xbf16>, vector<256x256xbf16>, vector<16x256xf32> -> vector<16x256xf32>
    %c0_i32 = arith.constant 0 : i32
    %3 = arith.cmpi eq, %arg1, %c0_i32 : i32
    %4 = arith.extui %3 : i1 to i32
    %c0_i32_3 = arith.constant 0 : i32
    %5 = arith.cmpi ne, %4, %c0_i32_3 : i32
    scf.if %5 {
      %c0_8 = arith.constant 0 : index
      %c0_9 = arith.constant 0 : index
      %12 = vector.load %arg7[%c0_8, %c0_9] : memref<16x256xf32, #tpu.memory_space<vmem>>, vector<16x256xf32>
      tpu.vector_store %arg7[%c0_8, %c0_9], %2 {strides = array<i32>} : memref<16x256xf32, #tpu.memory_space<vmem>>, vector<16x256xf32>,
    } else {
    }
    %c0_i32_4 = arith.constant 0 : i32
    %6 = arith.cmpi sgt, %arg1, %c0_i32_4 : i32
    %7 = arith.extui %6 : i1 to i32
    %c0_i32_5 = arith.constant 0 : i32
    %8 = arith.cmpi ne, %7, %c0_i32_5 : i32
    scf.if %8 {
      %c0_8 = arith.constant 0 : index
      %c0_9 = arith.constant 0 : index
      %12 = vector.load %arg7[%c0_8, %c0_9] : memref<16x256xf32, #tpu.memory_space<vmem>>, vector<16x256xf32>
      %13 = arith.addf %12, %2 : vector<16x256xf32>
      %c0_10 = arith.constant 0 : index
      %c0_11 = arith.constant 0 : index
      %14 = vector.load %arg7[%c0_10, %c0_11] : memref<16x256xf32, #tpu.memory_space<vmem>>, vector<16x256xf32>
      tpu.vector_store %arg7[%c0_10, %c0_11], %13 {strides = array<i32>} : memref<16x256xf32, #tpu.memory_space<vmem>>, vector<16x256xf32>,
    } else {
    }
    %c0_i32_6 = arith.constant 0 : i32
    %9 = arith.cmpi eq, %arg1, %c0_i32_6 : i32
    %10 = arith.extui %9 : i1 to i32
    %c0_i32_7 = arith.constant 0 : i32
    %11 = arith.cmpi ne, %10, %c0_i32_7 : i32
    scf.if %11 {
      %c0_8 = arith.constant 0 : index
      %c0_9 = arith.constant 0 : index
      %12 = vector.load %arg7[%c0_8, %c0_9] : memref<16x256xf32, #tpu.memory_space<vmem>>, vector<16x256xf32>
      %cst_10 = arith.constant dense<0.000000e+00> : vector<256xf32>
      %13 = vector.multi_reduction <add>, %12, %cst_10 [0] : vector<16x256xf32> to vector<256xf32>
      %14 = vector.shape_cast %13 : vector<256xf32> to vector<1x256xf32>
      %cst_11 = arith.constant 6.250000e-02 : f32
      %15 = vector.broadcast %cst_11 : f32 to vector<1x256xf32>
      %16 = arith.mulf %14, %15 : vector<1x256xf32>
      %17 = vector.broadcast %16 : vector<1x256xf32> to vector<16x256xf32>
      %18 = arith.subf %12, %17 : vector<16x256xf32>
      %19 = arith.mulf %18, %18 : vector<16x256xf32>
      %cst_12 = arith.constant dense<0.000000e+00> : vector<256xf32>
      %20 = vector.multi_reduction <add>, %19, %cst_12 [0] : vector<16x256xf32> to vector<256xf32>
      %21 = vector.shape_cast %20 : vector<256xf32> to vector<1x256xf32>
      %cst_13 = arith.constant 6.250000e-02 : f32
      %22 = vector.broadcast %cst_13 : f32 to vector<1x256xf32>
      %23 = arith.mulf %21, %22 : vector<1x256xf32>
      %c0_14 = arith.constant 0 : index
      %c0_15 = arith.constant 0 : index
      %24 = vector.load %arg4[%c0_14, %c0_15] : memref<1x256xf32, #tpu.memory_space<vmem>>, vector<1x256xf32>
      %cst_16 = arith.constant 9.99999974E-6 : f32
      %25 = vector.broadcast %cst_16 : f32 to vector<1x256xf32>
      %26 = arith.addf %23, %25 : vector<1x256xf32>
      %27 = math.rsqrt %26 : vector<1x256xf32>
      %28 = arith.mulf %24, %27 : vector<1x256xf32>
      %29 = vector.broadcast %28 : vector<1x256xf32> to vector<16x256xf32>
      %30 = arith.mulf %18, %29 : vector<16x256xf32>
      %c0_17 = arith.constant 0 : index
      %c0_18 = arith.constant 0 : index
      %31 = vector.load %arg5[%c0_17, %c0_18] : memref<1x256xf32, #tpu.memory_space<vmem>>, vector<1x256xf32>
      %32 = vector.broadcast %31 : vector<1x256xf32> to vector<16x256xf32>
      %33 = arith.addf %30, %32 : vector<16x256xf32>
      %cst_19 = arith.constant 0.000000e+00 : f32
      %34 = vector.broadcast %cst_19 : f32 to vector<16x256xf32>
      %35 = arith.subf %34, %33 : vector<16x256xf32>
      %36 = math.exp %35 : vector<16x256xf32>
      %cst_20 = arith.constant 1.000000e+00 : f32
      %37 = vector.broadcast %cst_20 : f32 to vector<16x256xf32>
      %38 = arith.addf %37, %36 : vector<16x256xf32>
      %39 = tpu.reciprocal %38 {approx = true} : vector<16x256xf32> -> vector<16x256xf32>
      %40 = arith.mulf %33, %39 : vector<16x256xf32>
      %c0_21 = arith.constant 0 : index
      %c0_22 = arith.constant 0 : index
      %41 = vector.load %arg6[%c0_21, %c0_22] : memref<16x256xf32, #tpu.memory_space<vmem>>, vector<16x256xf32>
      tpu.vector_store %arg6[%c0_21, %c0_22], %40 {strides = array<i32>} : memref<16x256xf32, #tpu.memory_space<vmem>>, vector<16x256xf32>,
    } else {
    }
    return
  }
  func.func @transform_0(%arg0: i32, %arg1: i32) -> (i32, i32) {
    %c0_i32 = arith.constant 0 : i32
    %c0_i32_0 = arith.constant 0 : i32
    return %c0_i32, %arg1 : i32, i32
  }
  func.func @transform_1(%arg0: i32, %arg1: i32) -> (i32, i32) {
    %c0_i32 = arith.constant 0 : i32
    return %arg1, %arg0 : i32, i32
  }
  func.func @transform_2(%arg0: i32, %arg1: i32) -> (i32, i32) {
    %c0_i32 = arith.constant 0 : i32
    %c0_i32_0 = arith.constant 0 : i32
    return %c0_i32, %arg0 : i32, i32
  }
  func.func @transform_3(%arg0: i32, %arg1: i32) -> (i32, i32) {
    %c0_i32 = arith.constant 0 : i32
    %c0_i32_0 = arith.constant 0 : i32
    return %c0_i32, %arg0 : i32, i32
  }
  func.func @transform_4(%arg0: i32, %arg1: i32) -> (i32, i32) {
    %c0_i32 = arith.constant 0 : i32
    %c0_i32_0 = arith.constant 0 : i32
    return %c0_i32, %arg0 : i32, i32
  }
}

</mosaic_0001>

<bundles_post_ra>
// kernel: tpu_custom_call.1
= control target key start
LH: loop header
LB: loop body
LE: loop exit
PB: predicated region body
PF: predicated region fallthrough
CT: control target
= control target key end

     0   :  { %9 = vsyncpa [#allocation4], 0  ;;  %s1483_s0 = inlined_call_operand.hbm [shape: bf16[16,256], index: 0, kind: input, shape index: {}]   ;;  %s1484_s1 = inlined_call_operand.hbm [shape: bf16[256,512], index: 1, kind: input, shape index: {}]   ;;  %s1485_s2 = inlined_call_operand.vmem [shape: f32[1,512], index: 2, kind: input, shape index: {}]   ;;  %s1486_s3 = inlined_call_operand.vmem [shape: f32[1,512], index: 3, kind: input, shape index: {}]   ;;  %s1487_s4 = inlined_call_operand.hbm [shape: f32[16,512], index: 4, kind: output, shape index: {}]  }
   0x1   :  { %10 = vsyncpa [#allocation7], 0 }
   0x2   :  { %12 = vsyncpa [#allocation7 + $0x1], 0 }
   0x3   :  { %13 = vsyncpa [#allocation5], 0 }
   0x4   :  { %15 = vsyncpa [#allocation5 + $0x1], 0  ;;  %s1216_s15 = smov 0   ;;  %s1218_s16 = smov 0  }
   0x5   :  { %s1220_s17 = smov 0   ;;  %s1222_s18 = smov 0  }
   0x6   :  { %s1224_s19 = smov 0   ;;  %s1226_s20 = smov 0  }
   0x7 LB: > { %s829_s21 = sadd.s32 4294967295, %s1179_s20   ;;  %s830_s22 = sadd.s32 4294967294, %s1179_s20   ;;  %s1179_s20 = sphi %s1226_s20, %s21_s20   ;;  %s1175_s19 = sphi %s1224_s19, %s1517_s19   ;;  %s1171_s18 = sphi %s1222_s18, %s1516_s18   ;;  %s1167_s17 = sphi %s1220_s17, %s1515_s17   ;;  %s1163_s16 = sphi %s1218_s16, %s1514_s16   ;;  %s1159_s15 = sphi %s1216_s15, %s1513_s15  }
   0x8   : > { %p75_p0 = scmp.ne.s32.totalorder %s1167_s17, %s1163_s16  ;;  %p76_p1 = scmp.eq.s32.totalorder %s1179_s20, 0 }
   0x9   : > { %p81_p2 = scmp.ne.s32.totalorder %s1163_s16, %s1159_s15  ;;  %p1253_p3 = scmp.eq.s32.totalorder %s829_s21, 0 }
   0xa   : > { %p1257_p4 = por %p76_p1, %p75_p0  ;;  %p157_p5 = scmp.eq.s32.totalorder %s829_s21, 1 }
   0xb   : > { %s1496_s23 = scalar_select %p1253_p3, 1, 0 }
   0xc   : > { %p1263_p6 = por %p1253_p3, %p81_p2  ;;  %p163_p7 = scmp.eq.s32.totalorder %s830_s22, 1 }
   0xd   : > { %p1267_p8 = por %p157_p5, %p75_p0  ;;  %p831_p9 = scmp.ge.s32.totalorder %s1179_s20, 1 }
   0xe   : > { %s1498_s25 = scalar_select %p1263_p6, 1, 0 }
   0xf   : > { %s1499_s26 = scalar_select %p1267_p8, 1, 0 }
  0x10   : > { %p1272_p10 = por %p163_p7, %p81_p2  ;;  %p170_p11 = scmp.lt.s32.totalorder %s1179_s20, 3 }
  0x11   : > { %s1181_s29 = smov [#allocation3]   ;;  %p905_p1 = scmp.lt.s32.totalorder %s1179_s20, 2 }
  0x12   : > { %s1500_s27 = scalar_select %p1272_p10, 1, 0 }
  0x13   : > { %p1277_p12 = pnand %p831_p9, %p170_p11  ;;  %s185_s30 = sshll.u32 %s1181_s29, 4  ;;  %s1281_s30 = int_to_ptr.vmem [resolvable:$true] %s185_s30 }
  0x14   : > { %p1295_p2 = pnand %p905_p1, %p1257_p4  ;;  %s33_s7 = sadd.s32 1, %s1175_s19 }
  0x15   : > { %s1501_s28 = scalar_select %p1277_p12, 1, 0 }
  0x16   : > { %p892_p13 = pneg %p1277_p12  ;;  %s1035_s10 = scalar_lea.hbm %s1483_s0, 256 }
  0x17   : > { %s1503_s6 = scalar_select %p1295_p2, 1, 0 }
  0x18   : > { %p1289_p5 = pnand %p892_p13, %p1253_p3  ;;  %p1036_p7 = scmp.ne.s32.totalorder %s1483_s0, %s1035_s10 }
  0x19   : > { %p1042_p4 = scmp.lt.u32.totalorder %s1035_s10, %s1483_s0 }
  0x1a   : > { %p1037_p9 = pneg %p1289_p5 }
  0x1c   : > { %p1038_p11 = pnand %p1037_p9, %p1036_p7 }
  0x1e   : > { %p1039_p13 = pneg %p1038_p11 }
  0x20   : > { %p1044_p1 = pnand %p1042_p4, %p1039_p13 }
  0x22   : > { %1047 = shalt.err (!%p1044_p1)
}
  0x23   : > { %s1048_s21 = scalar_lea.vmem %s1281_s30, 256  ;;  %p1056_p6 = scmp.lt.s32.totalorder %s1281_s30, %s1281_s30 }
  0x24   : > { %p1049_p0 = scmp.ne.s32.totalorder %s1281_s30, %s1048_s21  ;;  %p1057_p3 = scmp.lt.s32.totalorder %s1048_s21, %s1048_s21 }
  0x26   : > { %p1051_p10 = pnand %p1049_p0, %p1037_p9  ;;  %p1058_p12 = por %p1057_p3, %p1056_p6 }
  0x28   : > { %p1052_p8 = pneg %p1051_p10 }
  0x2a   : > { %p1059_p2 = pnand %p1058_p12, %p1052_p8 }
  0x2c   : > { %1062 = shalt.err (!%p1059_p2)
}
  0x2d   : > { %s1494_s22 = smov 128   ;;  %s1495_s24 = smov 8  }
  0x2e   : > { %895 = dma.hbm_to_vmem [thread:$0]  (!%p1289_p5), %s1483_s0, 256, %s1281_s30, [#allocation4], %s1494_s22, %s1494_s22, %s1495_s24  }
  0x2f   : > { %p35_p3 = scmp.ge.s32.totalorder %s33_s7, 2  ;;  %s68_s9 = sadd.s32 1, %s1167_s17 }
  0x30   : > { %s199_s10 = sand.u32 1, %s1167_s17   ;;  %s882_s13 = sshll.u32 %s1175_s19, 7 }
  0x31   : > { %s1519_s7 = smov (%p35_p3, %s33_s7), 0  ;;  %s834_s11 = sshll.u32 %s199_s10, 8 }
  0x32   : > { %s64_s12 = ssub.s32 %s1175_s19, %s1519_s7  ;;  %s1334_s21 = scalar_lea.hbm %s1484_s1, %s882_s13 }
  0x33   : > { %p66_p6 = scmp.eq.s32.totalorder %s64_s12, 0  ;;  %s203_s30 = scalar_lea.vmem [#allocation6], %s834_s11 }
  0x34   : > { %s213_s29 = sshll.u32 %s203_s30, 4  ;;  %s1341_s22 = scalar_lea.sflag [#allocation7], %s199_s10  ;;  %s1339_s29 = int_to_ptr.vmem [resolvable:$true] %s213_s29 }
  0x35   : > { %s1337_s8 = scalar_select %p66_p6, %s1167_s17, %s68_s9  }
  0x36   : > { %s1063_s24 = scalar_lea.hbm %s1334_s21, 4096  ;;  %p1504_p10 = scmp.ne.s32.totalorder %s1503_s6, 0 }
  0x37   : > { %p1064_p8 = scmp.ne.s32.totalorder %s1334_s21, %s1063_s24  ;;  %s1068_s5 = scalar_lea.hbm %s1484_s1, 8192 }
  0x38   : > { %p1065_p12 = pneg %p1504_p10  ;;  %p1069_p2 = scmp.lt.u32.totalorder %s1334_s21, %s1484_s1 }
  0x39   : > { %p1070_p7 = scmp.lt.u32.totalorder %s1068_s5, %s1063_s24  ;;  %p1072_p11 = scmp.lt.u32.totalorder %s1063_s24, %s1334_s21 }
  0x3a   : > { %p1066_p0 = pnand %p1065_p12, %p1064_p8 }
  0x3b   : > { %p1071_p9 = por %p1070_p7, %p1069_p2 }
  0x3c   : > { %p1067_p5 = pneg %p1066_p0 }
  0x3d   : > { %p1073_p13 = por %p1072_p11, %p1071_p9 }
  0x3f   : > { %p1074_p4 = pnand %p1073_p13, %p1067_p5 }
  0x41   : > { %1077 = shalt.err (!%p1074_p4)
}
  0x42   : > { %s1078_s9 = scalar_lea.vmem %s1339_s29, 4096  ;;  %s1184_s10 = smov [#allocation6]  }
  0x43   : > { %p1079_p1 = scmp.ne.s32.totalorder %s1339_s29, %s1078_s9  ;;  %s1083_s30 = sshll.u32 %s1184_s10, 4  ;;  %s1084_s30 = int_to_ptr.vmem [resolvable:$false] %s1083_s30 }
  0x44   : > { %s1085_s12 = scalar_lea.vmem %s1084_s30, 8192  ;;  %p1086_p8 = scmp.lt.s32.totalorder %s1339_s29, %s1084_s30 }
  0x45   : > { %p1081_p3 = pnand %p1079_p1, %p1065_p12  ;;  %p1087_p0 = scmp.lt.s32.totalorder %s1085_s12, %s1078_s9 }
  0x47   : > { %p1082_p6 = pneg %p1081_p3  ;;  %p1088_p2 = por %p1087_p0, %p1086_p8 }
  0x49   : > { %p1089_p7 = pnand %p1088_p2, %p1082_p6 }
  0x4b   : > { %1092 = shalt.err (!%p1089_p7)
}
  0x4c   : > { %s1185_s24 = smov 256   ;;  %s1505_s13 = smov 8  }
  0x4d   : > { %s1506_s5 = smov 128   ;;  %p1507_p12 = scmp.ne.s32.totalorder %s1501_s28, 0 }
  0x4e   : > { %899 = dma.hbm_to_vmem [thread:$0]  (!%p1504_p10), %s1334_s21, 4096, %s1339_s29, %s1341_s22, %s1185_s24, %s1506_s5, %s1505_s13  }
  0x4f   : > { %241 = sbr.rel (%p1507_p12) target bundleno = 483 (0x1e3), region = 36  ;;  %p1508_p5 = scmp.ne.s32.totalorder (!%p1507_p12), %s1496_s23, 0 }
  0x56   : > { %1146 = dma.done.wait (%p1508_p5), [#allocation4], 256  }
  0x57   : > { %1148 = vsyncadd (%p1508_p5), [#allocation4], 4294967040  ;;  %s1378_s11 = sand.u32 1, %s1163_s16   ;;  %p1509_p10 = scmp.ne.s32.totalorder %s1498_s25, 0 }
  0x58   : > { %s839_s6 = sshll.u32 %s1378_s11, 8  ;;  %s248_s14 = scalar_lea.sflag [#allocation7], %s1378_s11 }
  0x59   : > { %s1382_s9 = scalar_lea.vmem [#allocation6], %s839_s6 }
  0x5a   : > { %1150 = dma.done.wait (%p1509_p10), %s248_s14, 4096  }
  0x5b   : > { %1152 = vsyncadd (%p1509_p10), %s248_s14, 4294963200  ;;  %v964_v0 = vld [vmem:[%s1382_s9 + $0x4] ss:$8 sps:$4 sm:$0xff]   ;;  %v966_v1 = vld [vmem:[%s1382_s9] ss:$8 sps:$4 sm:$0xff]   ;;  %s841_s23 = sshll.u32 %s1171_s18, 1 }
  0x5c   : > { %502 = vmatprep.subr.bf16.mxu0 %v964_v0  ;;  %v967_v2 = vld [vmem:[%s1382_s9 + $0x14] ss:$8 sps:$4 sm:$0xff]   ;;  %v969_v3 = vld [vmem:[%s1382_s9 + $0x10] ss:$8 sps:$4 sm:$0xff]   ;;  %v970_v4 = vld [vmem:[%s1382_s9 + $0x24] ss:$8 sps:$4 sm:$0xff]  }
  0x5d   : > { %503 = vmatpush1.bf16.msra.mxu0 %v966_v1  ;;  %v972_v5 = vld [vmem:[%s1382_s9 + $0x20] ss:$8 sps:$4 sm:$0xff]   ;;  %v973_v6 = vld [vmem:[%s1382_s9 + $0x34] ss:$8 sps:$4 sm:$0xff]   ;;  %v975_v7 = vld [vmem:[%s1382_s9 + $0x30] ss:$8 sps:$4 sm:$0xff]  }
  0x5e   : > { %504 = vmatprep.subr.bf16.mxu0 %v967_v2  ;;  %v976_v8 = vld [vmem:[%s1382_s9 + $0x44] ss:$8 sps:$4 sm:$0xff]   ;;  %v978_v9 = vld [vmem:[%s1382_s9 + $0x40] ss:$8 sps:$4 sm:$0xff]   ;;  %v979_v10 = vld [vmem:[%s1382_s9 + $0x54] ss:$8 sps:$4 sm:$0xff]  }
  0x5f   : > { %v981_v11 = vld [vmem:[%s1382_s9 + $0x50] ss:$8 sps:$4 sm:$0xff]   ;;  %v982_v12 = vld [vmem:[%s1382_s9 + $0x64] ss:$8 sps:$4 sm:$0xff]   ;;  %v1014_v13 = vld [vmem:[#allocation3 + $0x4] ss:$8 sps:$4 sm:$0xff]  }
  0x60   : > { %v984_v14 = vld [vmem:[%s1382_s9 + $0x60] ss:$8 sps:$4 sm:$0xff]   ;;  %v985_v15 = vld [vmem:[%s1382_s9 + $0x74] ss:$8 sps:$4 sm:$0xff]   ;;  %534 = vmatprep.mubr.bf16.mxu0 %v1014_v13  ;;  %v987_v16 = vld [vmem:[%s1382_s9 + $0x70] ss:$8 sps:$4 sm:$0xff]  }
  0x61   : > { %505 = vmatpush1.bf16.msra.mxu0 %v969_v3  ;;  %v988_v17 = vld [vmem:[%s1382_s9 + $0x84] ss:$8 sps:$4 sm:$0xff]   ;;  %v990_v18 = vld [vmem:[%s1382_s9 + $0x80] ss:$8 sps:$4 sm:$0xff]   ;;  %v991_v19 = vld [vmem:[%s1382_s9 + $0x94] ss:$8 sps:$4 sm:$0xff]  }
  0x62   : > { %506 = vmatprep.subr.bf16.mxu0 %v970_v4  ;;  %v993_v20 = vld [vmem:[%s1382_s9 + $0x90] ss:$8 sps:$4 sm:$0xff]   ;;  %v994_v21 = vld [vmem:[%s1382_s9 + $0xa4] ss:$8 sps:$4 sm:$0xff]   ;;  %v996_v22 = vld [vmem:[%s1382_s9 + $0xa0] ss:$8 sps:$4 sm:$0xff]  }
  0x63   : > { %v997_v23 = vld [vmem:[%s1382_s9 + $0xb4] ss:$8 sps:$4 sm:$0xff]   ;;  %v999_v24 = vld [vmem:[%s1382_s9 + $0xb0] ss:$8 sps:$4 sm:$0xff]   ;;  %v1000_v25 = vld [vmem:[%s1382_s9 + $0xc4] ss:$8 sps:$4 sm:$0xff]  }
  0x64   : > { %v1002_v26 = vld [vmem:[%s1382_s9 + $0xc0] ss:$8 sps:$4 sm:$0xff]   ;;  %v1003_v27 = vld [vmem:[%s1382_s9 + $0xd4] ss:$8 sps:$4 sm:$0xff]   ;;  %v1005_v28 = vld [vmem:[%s1382_s9 + $0xd0] ss:$8 sps:$4 sm:$0xff]  }
  0x65   : > { %507 = vmatpush1.bf16.msra.mxu0 %v972_v5  ;;  %v1006_v29 = vld [vmem:[%s1382_s9 + $0xe4] ss:$8 sps:$4 sm:$0xff]   ;;  %v1008_v30 = vld [vmem:[%s1382_s9 + $0xe0] ss:$8 sps:$4 sm:$0xff]   ;;  %v1009_v31 = vld [vmem:[%s1382_s9 + $0xf4] ss:$8 sps:$4 sm:$0xff]  }
  0x66   : > { %508 = vmatprep.subr.bf16.mxu0 %v973_v6  ;;  %v1011_v32 = vld [vmem:[%s1382_s9 + $0xf0] ss:$8 sps:$4 sm:$0xff]   ;;  %p288_p9 = scmp.lt.s32.totalorder %s841_s23, 3  ;;  %s840_s30 = sshll.u32 %s1378_s11, 5 }
  0x67   : > { %v1012_v33 = vld [vmem:[#allocation3] ss:$8 sps:$4 sm:$0xff]   ;;  %s283_s12 = scalar_lea.vmem [#allocation8], %s840_s30  ;;  %s883_s13 = sshll.u32 %s1171_s18, 8 }
  0x68   : > { %s1521_s23 = smov (!%p288_p9, %s841_s23), 3  ;;  %s713_s24 = sshll.u32 %s283_s12, 4  ;;  %s1429_s24 = int_to_ptr.vmem [resolvable:$true] %s713_s24 }
  0x69   : > { %509 = vmatpush1.bf16.msra.mxu0 %v975_v7  ;;  %s290_s22 = scalar_lea.vmem %s1485_s2, %s1521_s23  ;;  %s295_s10 = scalar_lea.vmem %s1486_s3, %s1521_s23 }
  0x6a   : > { %510 = vmatprep.subr.bf16.mxu0 %v976_v8  ;;  %s1434_s14 = scalar_lea.hbm %s1487_s4, %s883_s13  ;;  %s700_s18 = scalar_lea.sflag [#allocation5], %s1378_s11 }
  0x6b   : > { %s1093_s9 = scalar_lea.vmem %s1429_s24, 512  ;;  %p1510_p13 = scmp.ne.s32.totalorder %s1499_s26, 0 }
  0x6c   : > { %p1094_p11 = scmp.ne.s32.totalorder %s1429_s24, %s1093_s9  ;;  %s1187_s23 = smov [#allocation8]  }
  0x6d   : > { %511 = vmatpush1.bf16.msra.mxu0 %v978_v9  ;;  %s1097_s25 = sshll.u32 %s1187_s23, 4  ;;  %s1098_s25 = int_to_ptr.vmem [resolvable:$false] %s1097_s25 }
  0x6e   : > { %512 = vmatprep.subr.bf16.mxu0 %v979_v10  ;;  %p1095_p4 = pnand %p1094_p11, %p1510_p13  ;;  %s1099_s28 = scalar_lea.vmem %s1098_s25, 1024 }
  0x6f   : > { %p1100_p3 = scmp.lt.s32.totalorder %s1429_s24, %s1098_s25  ;;  %p1101_p6 = scmp.lt.s32.totalorder %s1099_s28, %s1093_s9 }
  0x70   : > { %p1096_p1 = pneg %p1095_p4 }
  0x71   : > { %513 = vmatpush1.bf16.msra.mxu0 %v981_v11  ;;  %p1102_p8 = por %p1101_p6, %p1100_p3 }
  0x72   : > { %514 = vmatprep.subr.bf16.mxu0 %v982_v12 }
  0x73   : > { %p1103_p0 = pnand %p1102_p8, %p1096_p1 }
  0x75   : > { %515 = vmatpush1.bf16.msra.mxu0 %v984_v14 }
  0x76   : > { %516 = vmatprep.subr.bf16.mxu0 %v985_v15 }
  0x79   : > { %517 = vmatpush1.bf16.msra.mxu0 %v987_v16  ;;  %v1186_v16 = vmov 1966171168  }
  0x7a   : > { %518 = vmatprep.subr.bf16.mxu0 %v988_v17  ;;  %v625_v17 = vunpack.c.l.s4 %v1186_v16 }
  0x7d   : > { %519 = vmatpush1.bf16.msra.mxu0 %v990_v18  ;;  %v627_v18 = vlaneseq }
  0x7e   : > { %520 = vmatprep.subr.bf16.mxu0 %v991_v19  ;;  %v626_v19 = vunpack.c.0.s8 %v625_v17 }
  0x81   : > { %521 = vmatpush1.bf16.msra.mxu0 %v993_v20  ;;  %v628_v20 = vshrl.u32 %v627_v18, 7 }
  0x82   : > { %522 = vmatprep.subr.bf16.mxu0 %v994_v21 }
  0x85   : > { %523 = vmatpush1.bf16.msra.mxu0 %v996_v22  ;;  %v629_v22 = vsub.s32 %v626_v19, %v628_v20 }
  0x86   : > { %524 = vmatprep.subr.bf16.mxu0 %v997_v23 }
  0x89   : > { %525 = vmatpush1.bf16.msra.mxu0 %v999_v24 }
  0x8a   : > { %526 = vmatprep.subr.bf16.mxu0 %v1000_v25 }
  0x8d   : > { %527 = vmatpush1.bf16.msra.mxu0 %v1002_v26  ;;  %v616_v26 = vld [vmem:[%s290_s22] sm:$0x3] }
  0x8e   : > { %528 = vmatprep.subr.bf16.mxu0 %v1003_v27 }
  0x91   : > { %529 = vmatpush1.bf16.msra.mxu0 %v1005_v28  ;;  %v643_v28 = vsub.s32 0, %v628_v20 }
  0x92   : > { %530 = vmatprep.subr.bf16.mxu0 %v1006_v29  ;;  %v647_v29 = vsub.s32 1, %v628_v20 }
  0x95   : > { %531 = vmatpush1.bf16.msra.mxu0 %v1008_v30  ;;  %v655_v30 = vld [vmem:[%s295_s10] sm:$0x3] }
  0x96   : > { %532 = vmatprep.subr.bf16.mxu0 %v1009_v31 }
  0x99   : > { %533 = vmatpush1.bf16.msra.mxu0 %v1011_v32 }
  0x9c   : > { %535 = vmatmul.mubr.bf16.vlgmr.msra.gmra.mrb[0].mxu0 %v1012_v33 }
 0x16f   : > { %v536_v34 = vpop.f32.mrb[0].mxu0 }
 0x170   : > { %v538_v35 = vpop.f32.mrb[1].mxu0 }
 0x171   : > { %v540_v36 = vpop.f32.mrb[2].mxu0 }
 0x172   : > { %v576_v37 = vadd.f32 %v540_v36, %v536_v34  ;;  %v542_v38 = vpop.f32.mrb[3].mxu0 }
 0x173   : > { %v583_v39 = vadd.f32 %v542_v38, %v538_v35 }
 0x174   : > { %v577_v40 = vrot.slane %v576_v37, 4 }
 0x175   : > { %v584_v41 = vrot.slane %v583_v39, 4 }
 0x176   : > { %v578_v42 = vadd.f32 %v577_v40, %v576_v37 }
 0x177   : > { %v585_v43 = vadd.f32 %v584_v41, %v583_v39 }
 0x178   : > { %v579_v44 = vrot.slane %v578_v42, 2 }
 0x179   : > { %v586_v45 = vrot.slane %v585_v43, 2 }
 0x17a   : > { %v580_v46 = vadd.f32 %v579_v44, %v578_v42 }
 0x17b   : > { %v587_v47 = vadd.f32 %v586_v45, %v585_v43 }
 0x17c   : > { %v581_v48 = vrot.slane %v580_v46, 1 }
 0x17d   : > { %v588_v49 = vrot.slane %v587_v47, 1 }
 0x17e   : > { %v582_v50 = vadd.f32 %v581_v48, %v580_v46 }
 0x17f   : > { %v589_v51 = vadd.f32 %v588_v49, %v587_v47 }
 0x180   : > { %v590_v52 = vmul.f32 0.0625, %v582_v50 }
 0x181   : > { %v591_v53 = vmul.f32 0.0625, %v589_v51 }
 0x182   : > { %v592_v54 = vsub.f32 %v536_v34, %v590_v52  ;;  %v594_v55 = vsub.f32 %v540_v36, %v590_v52  ;;  %v660_v34 = vrot.slane %v655_v30, %v643_v28 }
 0x183   : > { %v593_v56 = vsub.f32 %v538_v35, %v591_v53  ;;  %v595_v57 = vsub.f32 %v542_v38, %v591_v53  ;;  %v664_v35 = vrot.slane %v655_v30, %v647_v29 }
 0x184   : > { %v596_v58 = vmul.f32 %v592_v54, %v592_v54  ;;  %v598_v59 = vmul.f32 %v594_v55, %v594_v55 }
 0x185   : > { %v597_v60 = vmul.f32 %v593_v56, %v593_v56  ;;  %v599_v61 = vmul.f32 %v595_v57, %v595_v57 }
 0x186   : > { %v600_v62 = vadd.f32 %v598_v59, %v596_v58 }
 0x187   : > { %v607_v63 = vadd.f32 %v599_v61, %v597_v60 }
 0x188   : > { %v601_v0 = vrot.slane %v600_v62, 4 }
 0x189   : > { %v608_v1 = vrot.slane %v607_v63, 4 }
 0x18a   : > { %v602_v2 = vadd.f32 %v601_v0, %v600_v62 }
 0x18b   : > { %v609_v3 = vadd.f32 %v608_v1, %v607_v63 }
 0x18c   : > { %v603_v4 = vrot.slane %v602_v2, 2 }
 0x18d   : > { %v610_v5 = vrot.slane %v609_v3, 2 }
 0x18e   : > { %v604_v6 = vadd.f32 %v603_v4, %v602_v2 }
 0x18f   : > { %v611_v7 = vadd.f32 %v610_v5, %v609_v3 }
 0x190   : > { %v605_v8 = vrot.slane %v604_v6, 1 }
 0x191   : > { %v612_v9 = vrot.slane %v611_v7, 1 }
 0x192   : > { %v606_v10 = vadd.f32 %v605_v8, %v604_v6 }
 0x193   : > { %v613_v11 = vadd.f32 %v612_v9, %v611_v7 }
 0x194   : > { %v614_v12 = vmul.f32 0.0625, %v606_v10 }
 0x195   : > { %v615_v13 = vmul.f32 0.0625, %v613_v11 }
 0x196   : > { %v617_v14 = vadd.f32 1e-05, %v614_v12 }
 0x197   : > { %v618_v15 = vadd.f32 1e-05, %v615_v13 }
 0x198   : > { %1015 = vrsqrt.f32 %v617_v14 }
 0x199   : > { %1017 = vrsqrt.f32 %v618_v15 }
 0x1a2   : > { %v1016_v21 = vpop.eup %1015 }
 0x1a3   : > { %v1018_v23 = vpop.eup %1017 }
 0x1a4   : > { %v623_v24 = vcombine.low %v1016_v21, %v1018_v23 }
 0x1a6   : > { %v630_v25 = vrot.slane %v623_v24, %v629_v22 }
 0x1a8   : > { %v637_v27 = vrot.slane %v630_v25, %v629_v22 }
 0x1aa   : > { %v639_v31 = vmul.f32 %v637_v27, %v616_v26 }
 0x1ac   : > { %v644_v32 = vrot.slane %v639_v31, %v643_v28  ;;  %v648_v33 = vrot.slane %v639_v31, %v647_v29 }
 0x1ae   : > { %v651_v36 = vmul.f32 %v644_v32, %v592_v54  ;;  %v652_v37 = vmul.f32 %v648_v33, %v593_v56  ;;  %v653_v38 = vmul.f32 %v644_v32, %v594_v55  ;;  %v654_v39 = vmul.f32 %v648_v33, %v595_v57 }
 0x1b0   : > { %v667_v40 = vadd.f32 %v660_v34, %v651_v36  ;;  %v668_v41 = vadd.f32 %v664_v35, %v652_v37  ;;  %v669_v42 = vadd.f32 %v660_v34, %v653_v38  ;;  %v670_v43 = vadd.f32 %v664_v35, %v654_v39 }
 0x1b2   : > { %v671_v44 = vsub.f32 0.0, %v667_v40  ;;  %v672_v45 = vsub.f32 0.0, %v668_v41  ;;  %v673_v46 = vsub.f32 0.0, %v669_v42  ;;  %v674_v47 = vsub.f32 0.0, %v670_v43 }
 0x1b4   : > { %v675_v48 = vmul.f32 1.442695, %v671_v44  ;;  %v677_v49 = vmul.f32 1.442695, %v672_v45  ;;  %v679_v50 = vmul.f32 1.442695, %v673_v46 }
 0x1b5   : > { %v681_v51 = vmul.f32 1.442695, %v674_v47 }
 0x1b6   : > { %1019 = vpow2.f32 %v675_v48 }
 0x1b7   : > { %1021 = vpow2.f32 %v677_v49 }
 0x1b8   : > { %1023 = vpow2.f32 %v679_v50 }
 0x1b9   : > { %1025 = vpow2.f32 %v681_v51 }
 0x1c0   : > { %v1020_v52 = vpop.eup %1019 }
 0x1c1   : > { %v1022_v53 = vpop.eup %1021  ;;  %v683_v54 = vadd.f32 1.0, %v1020_v52 }
 0x1c2   : > { %v1024_v55 = vpop.eup %1023  ;;  %v684_v56 = vadd.f32 1.0, %v1022_v53 }
 0x1c3   : > { %v1026_v57 = vpop.eup %1025  ;;  %v685_v58 = vadd.f32 1.0, %v1024_v55  ;;  %1027 = vrcp.f32 %v683_v54 }
 0x1c4   : > { %v686_v59 = vadd.f32 1.0, %v1026_v57  ;;  %1029 = vrcp.f32 %v684_v56 }
 0x1c5   : > { %1031 = vrcp.f32 %v685_v58 }
 0x1c6   : > { %1033 = vrcp.f32 %v686_v59 }
 0x1cd   : > { %v1028_v60 = vpop.eup %1027 }
 0x1ce   : > { %v1030_v61 = vpop.eup %1029  ;;  %v691_v62 = vmul.f32 %v1028_v60, %v667_v40 }
 0x1cf   : > { %v1032_v63 = vpop.eup %1031  ;;  %v692_v0 = vmul.f32 %v1030_v61, %v668_v41 }
 0x1d0   : > { %v1034_v1 = vpop.eup %1033  ;;  %v693_v2 = vmul.f32 %v1032_v63, %v669_v42  ;;  %695 = vst [vmem:[%s283_s12] sm:$0xff] %v691_v62 }
 0x1d1   : > { %v694_v3 = vmul.f32 %v1034_v1, %v670_v43  ;;  %696 = vst [vmem:[%s283_s12 + $0x8] sm:$0xff] %v692_v0 }
 0x1d2   : > { %697 = vst [vmem:[%s283_s12 + $0x10] sm:$0xff] %v693_v2 }
 0x1d3   : > { %698 = vst [vmem:[%s283_s12 + $0x18] sm:$0xff] %v694_v3 }
 0x1d4   : > { %1106 = shalt.err (!%p1103_p0)
}
 0x1d5   : > { %s1107_s22 = scalar_lea.hbm %s1434_s14, 512  ;;  %s1111_s10 = scalar_lea.hbm %s1487_s4, 1024 }
 0x1d6   : > { %p1108_p2 = scmp.ne.s32.totalorder %s1434_s14, %s1107_s22  ;;  %p1112_p5 = scmp.lt.u32.totalorder %s1434_s14, %s1487_s4 }
 0x1d7   : > { %p1113_p10 = scmp.lt.u32.totalorder %s1111_s10, %s1107_s22  ;;  %p1115_p11 = scmp.lt.u32.totalorder %s1107_s22, %s1434_s14 }
 0x1d8   : > { %p1109_p7 = pnand %p1108_p2, %p1510_p13 }
 0x1d9   : > { %p1114_p9 = por %p1113_p10, %p1112_p5 }
 0x1da   : > { %p1110_p12 = pneg %p1109_p7 }
 0x1db   : > { %p1116_p4 = por %p1115_p11, %p1114_p9 }
 0x1dd   : > { %p1117_p1 = pnand %p1116_p4, %p1110_p12 }
 0x1df   : > { %1120 = shalt.err (!%p1117_p1)
}
 0x1e0   : > { %s1188_s13 = smov 256   ;;  %s1189_s5 = smov 512  }
 0x1e1   : > { %s1190_s6 = smov 16  }
 0x1e2   : > { %890 = dma.vmem_to_hbm [thread:$0]  (%p1510_p13), %s1429_s24, 512, %s1434_s14, %s700_s18, %s1188_s13, %s1189_s5, %s1190_s6  }
 0x1e3 PF: > { %s728_s9 = sand.u32 1, %s1159_s15   ;;  %p1511_p3 = scmp.ne.s32.totalorder %s1500_s27, 0 }
 0x1e4   : > { %p1512_p6 = scmp.ge.s32.totalorder %s1179_s20, 2  ;;  %s729_s23 = scalar_lea.sflag [#allocation5], %s728_s9 }
 0x1e6   : > { %p901_p8 = pnand %p1512_p6, %p1511_p3 }
 0x1e8   : > { %1154 = dma.done.wait (!%p901_p8), %s729_s23, 512  }
 0x1e9   : > { %1156 = vsyncadd (!%p901_p8), %s729_s23, 4294966784  ;;  %s21_s20 = sadd.s32 1, %s1179_s20   ;;  %s1513_s15 = smov %s1163_s16 }
 0x1ea   : > { %p18_p0 = scmp.ge.s32.totalorder %s21_s20, 4   ;;  %s1514_s16 = smov %s1167_s17 }
 0x1eb   : > { %s1515_s17 = smov %s1337_s8  ;;  %s1516_s18 = smov %s1175_s19 }
 0x1ec   : > { %s1517_s19 = smov %s1519_s7  ;;  %20 = sbr.rel (!%p18_p0) target bundleno = 7 (0x7), region = 105 }
 0x1f3   :  { %734 = vsyncpa [#allocation4], 1 }
 0x1f4   :  { %736 = vsyncpa [#allocation4 + $0x1], 1 }
 0x1f5   :  { %737 = vsyncpa [#allocation7], 1 }
 0x1f6   :  { %739 = vsyncpa [#allocation7 + $0x1], 1 }
 0x1f7   :  { %740 = vsyncpa [#allocation5], 1 }
 0x1f8   :  { %742 = vsyncpa [#allocation5 + $0x1], 1 }

// kernel: tpu_custom_call.1
= control target key start
LH: loop header
LB: loop body
LE: loop exit
PB: predicated region body
PF: predicated region fallthrough
CT: control target
= control target key end

     0   :  { %9 = vsyncpa [#allocation4], 0  ;;  %s1483_s0 = inlined_call_operand.hbm [shape: bf16[16,256], index: 0, kind: input, shape index: {}]   ;;  %s1484_s1 = inlined_call_operand.hbm [shape: bf16[256,512], index: 1, kind: input, shape index: {}]   ;;  %s1485_s2 = inlined_call_operand.vmem [shape: f32[1,512], index: 2, kind: input, shape index: {}]   ;;  %s1486_s3 = inlined_call_operand.vmem [shape: f32[1,512], index: 3, kind: input, shape index: {}]   ;;  %s1487_s4 = inlined_call_operand.hbm [shape: f32[16,512], index: 4, kind: output, shape index: {}]  }
   0x1   :  { %10 = vsyncpa [#allocation7], 0 }
   0x2   :  { %12 = vsyncpa [#allocation7 + $0x1], 0 }
   0x3   :  { %13 = vsyncpa [#allocation5], 0 }
   0x4   :  { %15 = vsyncpa [#allocation5 + $0x1], 0  ;;  %s1216_s15 = smov 0   ;;  %s1218_s16 = smov 0  }
   0x5   :  { %s1220_s17 = smov 0   ;;  %s1222_s18 = smov 0  }
   0x6   :  { %s1224_s19 = smov 0   ;;  %s1226_s20 = smov 0  }
   0x7 LB: > { %s829_s21 = sadd.s32 4294967295, %s1179_s20   ;;  %s830_s22 = sadd.s32 4294967294, %s1179_s20   ;;  %s1179_s20 = sphi %s1226_s20, %s21_s20   ;;  %s1175_s19 = sphi %s1224_s19, %s1517_s19   ;;  %s1171_s18 = sphi %s1222_s18, %s1516_s18   ;;  %s1167_s17 = sphi %s1220_s17, %s1515_s17   ;;  %s1163_s16 = sphi %s1218_s16, %s1514_s16   ;;  %s1159_s15 = sphi %s1216_s15, %s1513_s15  }
   0x8   : > { %p75_p0 = scmp.ne.s32.totalorder %s1167_s17, %s1163_s16  ;;  %p76_p1 = scmp.eq.s32.totalorder %s1179_s20, 0 }
   0x9   : > { %p81_p2 = scmp.ne.s32.totalorder %s1163_s16, %s1159_s15  ;;  %p1253_p3 = scmp.eq.s32.totalorder %s829_s21, 0 }
   0xa   : > { %p1257_p4 = por %p76_p1, %p75_p0  ;;  %p157_p5 = scmp.eq.s32.totalorder %s829_s21, 1 }
   0xb   : > { %s1496_s23 = scalar_select %p1253_p3, 1, 0 }
   0xc   : > { %p1263_p6 = por %p1253_p3, %p81_p2  ;;  %p163_p7 = scmp.eq.s32.totalorder %s830_s22, 1 }
   0xd   : > { %p1267_p8 = por %p157_p5, %p75_p0  ;;  %p831_p9 = scmp.ge.s32.totalorder %s1179_s20, 1 }
   0xe   : > { %s1498_s25 = scalar_select %p1263_p6, 1, 0 }
   0xf   : > { %s1499_s26 = scalar_select %p1267_p8, 1, 0 }
  0x10   : > { %p1272_p10 = por %p163_p7, %p81_p2  ;;  %p170_p11 = scmp.lt.s32.totalorder %s1179_s20, 3 }
  0x11   : > { %s1181_s29 = smov [#allocation3]   ;;  %p905_p1 = scmp.lt.s32.totalorder %s1179_s20, 2 }
  0x12   : > { %s1500_s27 = scalar_select %p1272_p10, 1, 0 }
  0x13   : > { %p1277_p12 = pnand %p831_p9, %p170_p11  ;;  %s185_s30 = sshll.u32 %s1181_s29, 4  ;;  %s1281_s30 = int_to_ptr.vmem [resolvable:$true] %s185_s30 }
  0x14   : > { %p1295_p2 = pnand %p905_p1, %p1257_p4  ;;  %s33_s7 = sadd.s32 1, %s1175_s19 }
  0x15   : > { %s1501_s28 = scalar_select %p1277_p12, 1, 0 }
  0x16   : > { %p892_p13 = pneg %p1277_p12  ;;  %s1035_s10 = scalar_lea.hbm %s1483_s0, 256 }
  0x17   : > { %s1503_s6 = scalar_select %p1295_p2, 1, 0 }
  0x18   : > { %p1289_p5 = pnand %p892_p13, %p1253_p3  ;;  %p1036_p7 = scmp.ne.s32.totalorder %s1483_s0, %s1035_s10 }
  0x19   : > { %p1042_p4 = scmp.lt.u32.totalorder %s1035_s10, %s1483_s0 }
  0x1a   : > { %p1037_p9 = pneg %p1289_p5 }
  0x1c   : > { %p1038_p11 = pnand %p1037_p9, %p1036_p7 }
  0x1e   : > { %p1039_p13 = pneg %p1038_p11 }
  0x20   : > { %p1044_p1 = pnand %p1042_p4, %p1039_p13 }
  0x22   : > { %1047 = shalt.err (!%p1044_p1)
}
  0x23   : > { %s1048_s21 = scalar_lea.vmem %s1281_s30, 256  ;;  %p1056_p6 = scmp.lt.s32.totalorder %s1281_s30, %s1281_s30 }
  0x24   : > { %p1049_p0 = scmp.ne.s32.totalorder %s1281_s30, %s1048_s21  ;;  %p1057_p3 = scmp.lt.s32.totalorder %s1048_s21, %s1048_s21 }
  0x26   : > { %p1051_p10 = pnand %p1049_p0, %p1037_p9  ;;  %p1058_p12 = por %p1057_p3, %p1056_p6 }
  0x28   : > { %p1052_p8 = pneg %p1051_p10 }
  0x2a   : > { %p1059_p2 = pnand %p1058_p12, %p1052_p8 }
  0x2c   : > { %1062 = shalt.err (!%p1059_p2)
}
  0x2d   : > { %s1494_s22 = smov 128   ;;  %s1495_s24 = smov 8  }
  0x2e   : > { %895 = dma.hbm_to_vmem [thread:$0]  (!%p1289_p5), %s1483_s0, 256, %s1281_s30, [#allocation4], %s1494_s22, %s1494_s22, %s1495_s24  }
  0x2f   : > { %p35_p3 = scmp.ge.s32.totalorder %s33_s7, 2  ;;  %s68_s9 = sadd.s32 1, %s1167_s17 }
  0x30   : > { %s199_s10 = sand.u32 1, %s1167_s17   ;;  %s882_s13 = sshll.u32 %s1175_s19, 7 }
  0x31   : > { %s1519_s7 = smov (%p35_p3, %s33_s7), 0  ;;  %s834_s11 = sshll.u32 %s199_s10, 8 }
  0x32   : > { %s64_s12 = ssub.s32 %s1175_s19, %s1519_s7  ;;  %s1334_s21 = scalar_lea.hbm %s1484_s1, %s882_s13 }
  0x33   : > { %p66_p6 = scmp.eq.s32.totalorder %s64_s12, 0  ;;  %s203_s30 = scalar_lea.vmem [#allocation6], %s834_s11 }
  0x34   : > { %s213_s29 = sshll.u32 %s203_s30, 4  ;;  %s1341_s22 = scalar_lea.sflag [#allocation7], %s199_s10  ;;  %s1339_s29 = int_to_ptr.vmem [resolvable:$true] %s213_s29 }
  0x35   : > { %s1337_s8 = scalar_select %p66_p6, %s1167_s17, %s68_s9  }
  0x36   : > { %s1063_s24 = scalar_lea.hbm %s1334_s21, 4096  ;;  %p1504_p10 = scmp.ne.s32.totalorder %s1503_s6, 0 }
  0x37   : > { %p1064_p8 = scmp.ne.s32.totalorder %s1334_s21, %s1063_s24  ;;  %s1068_s5 = scalar_lea.hbm %s1484_s1, 8192 }
  0x38   : > { %p1065_p12 = pneg %p1504_p10  ;;  %p1069_p2 = scmp.lt.u32.totalorder %s1334_s21, %s1484_s1 }
  0x39   : > { %p1070_p7 = scmp.lt.u32.totalorder %s1068_s5, %s1063_s24  ;;  %p1072_p11 = scmp.lt.u32.totalorder %s1063_s24, %s1334_s21 }
  0x3a   : > { %p1066_p0 = pnand %p1065_p12, %p1064_p8 }
  0x3b   : > { %p1071_p9 = por %p1070_p7, %p1069_p2 }
  0x3c   : > { %p1067_p5 = pneg %p1066_p0 }
  0x3d   : > { %p1073_p13 = por %p1072_p11, %p1071_p9 }
  0x3f   : > { %p1074_p4 = pnand %p1073_p13, %p1067_p5 }
  0x41   : > { %1077 = shalt.err (!%p1074_p4)
}
  0x42   : > { %s1078_s9 = scalar_lea.vmem %s1339_s29, 4096  ;;  %s1184_s10 = smov [#allocation6]  }
  0x43   : > { %p1079_p1 = scmp.ne.s32.totalorder %s1339_s29, %s1078_s9  ;;  %s1083_s30 = sshll.u32 %s1184_s10, 4  ;;  %s1084_s30 = int_to_ptr.vmem [resolvable:$false] %s1083_s30 }
  0x44   : > { %s1085_s12 = scalar_lea.vmem %s1084_s30, 8192  ;;  %p1086_p8 = scmp.lt.s32.totalorder %s1339_s29, %s1084_s30 }
  0x45   : > { %p1081_p3 = pnand %p1079_p1, %p1065_p12  ;;  %p1087_p0 = scmp.lt.s32.totalorder %s1085_s12, %s1078_s9 }
  0x47   : > { %p1082_p6 = pneg %p1081_p3  ;;  %p1088_p2 = por %p1087_p0, %p1086_p8 }
  0x49   : > { %p1089_p7 = pnand %p1088_p2, %p1082_p6 }
  0x4b   : > { %1092 = shalt.err (!%p1089_p7)
}
  0x4c   : > { %s1185_s24 = smov 256   ;;  %s1505_s13 = smov 8  }
  0x4d   : > { %s1506_s5 = smov 128   ;;  %p1507_p12 = scmp.ne.s32.totalorder %s1501_s28, 0 }
  0x4e   : > { %899 = dma.hbm_to_vmem [thread:$0]  (!%p1504_p10), %s1334_s21, 4096, %s1339_s29, %s1341_s22, %s1185_s24, %s1506_s5, %s1505_s13  }
  0x4f   : > { %241 = sbr.rel (%p1507_p12) target bundleno = 483 (0x1e3), region = 36  ;;  %p1508_p5 = scmp.ne.s32.totalorder (!%p1507_p12), %s1496_s23, 0 }
  0x56   : > { %1146 = dma.done.wait (%p1508_p5), [#allocation4], 256  }
  0x57   : > { %1148 = vsyncadd (%p1508_p5), [#allocation4], 4294967040  ;;  %s1378_s11 = sand.u32 1, %s1163_s16   ;;  %p1509_p10 = scmp.ne.s32.totalorder %s1498_s25, 0 }
  0x58   : > { %s839_s6 = sshll.u32 %s1378_s11, 8  ;;  %s248_s14 = scalar_lea.sflag [#allocation7], %s1378_s11 }
  0x59   : > { %s1382_s9 = scalar_lea.vmem [#allocation6], %s839_s6 }
  0x5a   : > { %1150 = dma.done.wait (%p1509_p10), %s248_s14, 4096  }
  0x5b   : > { %1152 = vsyncadd (%p1509_p10), %s248_s14, 4294963200  ;;  %v964_v0 = vld [vmem:[%s1382_s9 + $0x4] ss:$8 sps:$4 sm:$0xff]   ;;  %v966_v1 = vld [vmem:[%s1382_s9] ss:$8 sps:$4 sm:$0xff]   ;;  %s841_s23 = sshll.u32 %s1171_s18, 1 }
  0x5c   : > { %502 = vmatprep.subr.bf16.mxu0 %v964_v0  ;;  %v967_v2 = vld [vmem:[%s1382_s9 + $0x14] ss:$8 sps:$4 sm:$0xff]   ;;  %v969_v3 = vld [vmem:[%s1382_s9 + $0x10] ss:$8 sps:$4 sm:$0xff]   ;;  %v970_v4 = vld [vmem:[%s1382_s9 + $0x24] ss:$8 sps:$4 sm:$0xff]  }
  0x5d   : > { %503 = vmatpush1.bf16.msra.mxu0 %v966_v1  ;;  %v972_v5 = vld [vmem:[%s1382_s9 + $0x20] ss:$8 sps:$4 sm:$0xff]   ;;  %v973_v6 = vld [vmem:[%s1382_s9 + $0x34] ss:$8 sps:$4 sm:$0xff]   ;;  %v975_v7 = vld [vmem:[%s1382_s9 + $0x30] ss:$8 sps:$4 sm:$0xff]  }
  0x5e   : > { %504 = vmatprep.subr.bf16.mxu0 %v967_v2  ;;  %v976_v8 = vld [vmem:[%s1382_s9 + $0x44] ss:$8 sps:$4 sm:$0xff]   ;;  %v978_v9 = vld [vmem:[%s1382_s9 + $0x40] ss:$8 sps:$4 sm:$0xff]   ;;  %v979_v10 = vld [vmem:[%s1382_s9 + $0x54] ss:$8 sps:$4 sm:$0xff]  }
  0x5f   : > { %v981_v11 = vld [vmem:[%s1382_s9 + $0x50] ss:$8 sps:$4 sm:$0xff]   ;;  %v982_v12 = vld [vmem:[%s1382_s9 + $0x64] ss:$8 sps:$4 sm:$0xff]   ;;  %v1014_v13 = vld [vmem:[#allocation3 + $0x4] ss:$8 sps:$4 sm:$0xff]  }
  0x60   : > { %v984_v14 = vld [vmem:[%s1382_s9 + $0x60] ss:$8 sps:$4 sm:$0xff]   ;;  %v985_v15 = vld [vmem:[%s1382_s9 + $0x74] ss:$8 sps:$4 sm:$0xff]   ;;  %534 = vmatprep.mubr.bf16.mxu0 %v1014_v13  ;;  %v987_v16 = vld [vmem:[%s1382_s9 + $0x70] ss:$8 sps:$4 sm:$0xff]  }
  0x61   : > { %505 = vmatpush1.bf16.msra.mxu0 %v969_v3  ;;  %v988_v17 = vld [vmem:[%s1382_s9 + $0x84] ss:$8 sps:$4 sm:$0xff]   ;;  %v990_v18 = vld [vmem:[%s1382_s9 + $0x80] ss:$8 sps:$4 sm:$0xff]   ;;  %v991_v19 = vld [vmem:[%s1382_s9 + $0x94] ss:$8 sps:$4 sm:$0xff]  }
  0x62   : > { %506 = vmatprep.subr.bf16.mxu0 %v970_v4  ;;  %v993_v20 = vld [vmem:[%s1382_s9 + $0x90] ss:$8 sps:$4 sm:$0xff]   ;;  %v994_v21 = vld [vmem:[%s1382_s9 + $0xa4] ss:$8 sps:$4 sm:$0xff]   ;;  %v996_v22 = vld [vmem:[%s1382_s9 + $0xa0] ss:$8 sps:$4 sm:$0xff]  }
  0x63   : > { %v997_v23 = vld [vmem:[%s1382_s9 + $0xb4] ss:$8 sps:$4 sm:$0xff]   ;;  %v999_v24 = vld [vmem:[%s1382_s9 + $0xb0] ss:$8 sps:$4 sm:$0xff]   ;;  %v1000_v25 = vld [vmem:[%s1382_s9 + $0xc4] ss:$8 sps:$4 sm:$0xff]  }
  0x64   : > { %v1002_v26 = vld [vmem:[%s1382_s9 + $0xc0] ss:$8 sps:$4 sm:$0xff]   ;;  %v1003_v27 = vld [vmem:[%s1382_s9 + $0xd4] ss:$8 sps:$4 sm:$0xff]   ;;  %v1005_v28 = vld [vmem:[%s1382_s9 + $0xd0] ss:$8 sps:$4 sm:$0xff]  }
  0x65   : > { %507 = vmatpush1.bf16.msra.mxu0 %v972_v5  ;;  %v1006_v29 = vld [vmem:[%s1382_s9 + $0xe4] ss:$8 sps:$4 sm:$0xff]   ;;  %v1008_v30 = vld [vmem:[%s1382_s9 + $0xe0] ss:$8 sps:$4 sm:$0xff]   ;;  %v1009_v31 = vld [vmem:[%s1382_s9 + $0xf4] ss:$8 sps:$4 sm:$0xff]  }
  0x66   : > { %508 = vmatprep.subr.bf16.mxu0 %v973_v6  ;;  %v1011_v32 = vld [vmem:[%s1382_s9 + $0xf0] ss:$8 sps:$4 sm:$0xff]   ;;  %p288_p9 = scmp.lt.s32.totalorder %s841_s23, 3  ;;  %s840_s30 = sshll.u32 %s1378_s11, 5 }
  0x67   : > { %v1012_v33 = vld [vmem:[#allocation3] ss:$8 sps:$4 sm:$0xff]   ;;  %s283_s12 = scalar_lea.vmem [#allocation8], %s840_s30  ;;  %s883_s13 = sshll.u32 %s1171_s18, 8 }
  0x68   : > { %s1521_s23 = smov (!%p288_p9, %s841_s23), 3  ;;  %s713_s24 = sshll.u32 %s283_s12, 4  ;;  %s1429_s24 = int_to_ptr.vmem [resolvable:$true] %s713_s24 }
  0x69   : > { %509 = vmatpush1.bf16.msra.mxu0 %v975_v7  ;;  %s290_s22 = scalar_lea.vmem %s1485_s2, %s1521_s23  ;;  %s295_s10 = scalar_lea.vmem %s1486_s3, %s1521_s23 }
  0x6a   : > { %510 = vmatprep.subr.bf16.mxu0 %v976_v8  ;;  %s1434_s14 = scalar_lea.hbm %s1487_s4, %s883_s13  ;;  %s700_s18 = scalar_lea.sflag [#allocation5], %s1378_s11 }
  0x6b   : > { %s1093_s9 = scalar_lea.vmem %s1429_s24, 512  ;;  %p1510_p13 = scmp.ne.s32.totalorder %s1499_s26, 0 }
  0x6c   : > { %p1094_p11 = scmp.ne.s32.totalorder %s1429_s24, %s1093_s9  ;;  %s1187_s23 = smov [#allocation8]  }
  0x6d   : > { %511 = vmatpush1.bf16.msra.mxu0 %v978_v9  ;;  %s1097_s25 = sshll.u32 %s1187_s23, 4  ;;  %s1098_s25 = int_to_ptr.vmem [resolvable:$false] %s1097_s25 }
  0x6e   : > { %512 = vmatprep.subr.bf16.mxu0 %v979_v10  ;;  %p1095_p4 = pnand %p1094_p11, %p1510_p13  ;;  %s1099_s28 = scalar_lea.vmem %s1098_s25, 1024 }
  0x6f   : > { %p1100_p3 = scmp.lt.s32.totalorder %s1429_s24, %s1098_s25  ;;  %p1101_p6 = scmp.lt.s32.totalorder %s1099_s28, %s1093_s9 }
  0x70   : > { %p1096_p1 = pneg %p1095_p4 }
  0x71   : > { %513 = vmatpush1.bf16.msra.mxu0 %v981_v11  ;;  %p1102_p8 = por %p1101_p6, %p1100_p3 }
  0x72   : > { %514 = vmatprep.subr.bf16.mxu0 %v982_v12 }
  0x73   : > { %p1103_p0 = pnand %p1102_p8, %p1096_p1 }
  0x75   : > { %515 = vmatpush1.bf16.msra.mxu0 %v984_v14 }
  0x76   : > { %516 = vmatprep.subr.bf16.mxu0 %v985_v15 }
  0x79   : > { %517 = vmatpush1.bf16.msra.mxu0 %v987_v16  ;;  %v1186_v16 = vmov 1966171168  }
  0x7a   : > { %518 = vmatprep.subr.bf16.mxu0 %v988_v17  ;;  %v625_v17 = vunpack.c.l.s4 %v1186_v16 }
  0x7d   : > { %519 = vmatpush1.bf16.msra.mxu0 %v990_v18  ;;  %v627_v18 = vlaneseq }
  0x7e   : > { %520 = vmatprep.subr.bf16.mxu0 %v991_v19  ;;  %v626_v19 = vunpack.c.0.s8 %v625_v17 }
  0x81   : > { %521 = vmatpush1.bf16.msra.mxu0 %v993_v20  ;;  %v628_v20 = vshrl.u32 %v627_v18, 7 }
  0x82   : > { %522 = vmatprep.subr.bf16.mxu0 %v994_v21 }
  0x85   : > { %523 = vmatpush1.bf16.msra.mxu0 %v996_v22  ;;  %v629_v22 = vsub.s32 %v626_v19, %v628_v20 }
  0x86   : > { %524 = vmatprep.subr.bf16.mxu0 %v997_v23 }
  0x89   : > { %525 = vmatpush1.bf16.msra.mxu0 %v999_v24 }
  0x8a   : > { %526 = vmatprep.subr.bf16.mxu0 %v1000_v25 }
  0x8d   : > { %527 = vmatpush1.bf16.msra.mxu0 %v1002_v26  ;;  %v616_v26 = vld [vmem:[%s290_s22] sm:$0x3] }
  0x8e   : > { %528 = vmatprep.subr.bf16.mxu0 %v1003_v27 }
  0x91   : > { %529 = vmatpush1.bf16.msra.mxu0 %v1005_v28  ;;  %v643_v28 = vsub.s32 0, %v628_v20 }
  0x92   : > { %530 = vmatprep.subr.bf16.mxu0 %v1006_v29  ;;  %v647_v29 = vsub.s32 1, %v628_v20 }
  0x95   : > { %531 = vmatpush1.bf16.msra.mxu0 %v1008_v30  ;;  %v655_v30 = vld [vmem:[%s295_s10] sm:$0x3] }
  0x96   : > { %532 = vmatprep.subr.bf16.mxu0 %v1009_v31 }
  0x99   : > { %533 = vmatpush1.bf16.msra.mxu0 %v1011_v32 }
  0x9c   : > { %535 = vmatmul.mubr.bf16.vlgmr.msra.gmra.mrb[0].mxu0 %v1012_v33 }
 0x16f   : > { %v536_v34 = vpop.f32.mrb[0].mxu0 }
 0x170   : > { %v538_v35 = vpop.f32.mrb[1].mxu0 }
 0x171   : > { %v540_v36 = vpop.f32.mrb[2].mxu0 }
 0x172   : > { %v576_v37 = vadd.f32 %v540_v36, %v536_v34  ;;  %v542_v38 = vpop.f32.mrb[3].mxu0 }
 0x173   : > { %v583_v39 = vadd.f32 %v542_v38, %v538_v35 }
 0x174   : > { %v577_v40 = vrot.slane %v576_v37, 4 }
 0x175   : > { %v584_v41 = vrot.slane %v583_v39, 4 }
 0x176   : > { %v578_v42 = vadd.f32 %v577_v40, %v576_v37 }
 0x177   : > { %v585_v43 = vadd.f32 %v584_v41, %v583_v39 }
 0x178   : > { %v579_v44 = vrot.slane %v578_v42, 2 }
 0x179   : > { %v586_v45 = vrot.slane %v585_v43, 2 }
 0x17a   : > { %v580_v46 = vadd.f32 %v579_v44, %v578_v42 }
 0x17b   : > { %v587_v47 = vadd.f32 %v586_v45, %v585_v43 }
 0x17c   : > { %v581_v48 = vrot.slane %v580_v46, 1 }
 0x17d   : > { %v588_v49 = vrot.slane %v587_v47, 1 }
 0x17e   : > { %v582_v50 = vadd.f32 %v581_v48, %v580_v46 }
 0x17f   : > { %v589_v51 = vadd.f32 %v588_v49, %v587_v47 }
 0x180   : > { %v590_v52 = vmul.f32 0.0625, %v582_v50 }
 0x181   : > { %v591_v53 = vmul.f32 0.0625, %v589_v51 }
 0x182   : > { %v592_v54 = vsub.f32 %v536_v34, %v590_v52  ;;  %v594_v55 = vsub.f32 %v540_v36, %v590_v52  ;;  %v660_v34 = vrot.slane %v655_v30, %v643_v28 }
 0x183   : > { %v593_v56 = vsub.f32 %v538_v35, %v591_v53  ;;  %v595_v57 = vsub.f32 %v542_v38, %v591_v53  ;;  %v664_v35 = vrot.slane %v655_v30, %v647_v29 }
 0x184   : > { %v596_v58 = vmul.f32 %v592_v54, %v592_v54  ;;  %v598_v59 = vmul.f32 %v594_v55, %v594_v55 }
 0x185   : > { %v597_v60 = vmul.f32 %v593_v56, %v593_v56  ;;  %v599_v61 = vmul.f32 %v595_v57, %v595_v57 }
 0x186   : > { %v600_v62 = vadd.f32 %v598_v59, %v596_v58 }
 0x187   : > { %v607_v63 = vadd.f32 %v599_v61, %v597_v60 }
 0x188   : > { %v601_v0 = vrot.slane %v600_v62, 4 }
 0x189   : > { %v608_v1 = vrot.slane %v607_v63, 4 }
 0x18a   : > { %v602_v2 = vadd.f32 %v601_v0, %v600_v62 }
 0x18b   : > { %v609_v3 = vadd.f32 %v608_v1, %v607_v63 }
 0x18c   : > { %v603_v4 = vrot.slane %v602_v2, 2 }
 0x18d   : > { %v610_v5 = vrot.slane %v609_v3, 2 }
 0x18e   : > { %v604_v6 = vadd.f32 %v603_v4, %v602_v2 }
 0x18f   : > { %v611_v7 = vadd.f32 %v610_v5, %v609_v3 }
 0x190   : > { %v605_v8 = vrot.slane %v604_v6, 1 }
 0x191   : > { %v612_v9 = vrot.slane %v611_v7, 1 }
 0x192   : > { %v606_v10 = vadd.f32 %v605_v8, %v604_v6 }
 0x193   : > { %v613_v11 = vadd.f32 %v612_v9, %v611_v7 }
 0x194   : > { %v614_v12 = vmul.f32 0.0625, %v606_v10 }
 0x195   : > { %v615_v13 = vmul.f32 0.0625, %v613_v11 }
 0x196   : > { %v617_v14 = vadd.f32 1e-05, %v614_v12 }
 0x197   : > { %v618_v15 = vadd.f32 1e-05, %v615_v13 }
 0x198   : > { %1015 = vrsqrt.f32 %v617_v14 }
 0x199   : > { %1017 = vrsqrt.f32 %v618_v15 }
 0x1a2   : > { %v1016_v21 = vpop.eup %1015 }
 0x1a3   : > { %v1018_v23 = vpop.eup %1017 }
 0x1a4   : > { %v623_v24 = vcombine.low %v1016_v21, %v1018_v23 }
 0x1a6   : > { %v630_v25 = vrot.slane %v623_v24, %v629_v22 }
 0x1a8   : > { %v637_v27 = vrot.slane %v630_v25, %v629_v22 }
 0x1aa   : > { %v639_v31 = vmul.f32 %v637_v27, %v616_v26 }
 0x1ac   : > { %v644_v32 = vrot.slane %v639_v31, %v643_v28  ;;  %v648_v33 = vrot.slane %v639_v31, %v647_v29 }
 0x1ae   : > { %v651_v36 = vmul.f32 %v644_v32, %v592_v54  ;;  %v652_v37 = vmul.f32 %v648_v33, %v593_v56  ;;  %v653_v38 = vmul.f32 %v644_v32, %v594_v55  ;;  %v654_v39 = vmul.f32 %v648_v33, %v595_v57 }
 0x1b0   : > { %v667_v40 = vadd.f32 %v660_v34, %v651_v36  ;;  %v668_v41 = vadd.f32 %v664_v35, %v652_v37  ;;  %v669_v42 = vadd.f32 %v660_v34, %v653_v38  ;;  %v670_v43 = vadd.f32 %v664_v35, %v654_v39 }
 0x1b2   : > { %v671_v44 = vsub.f32 0.0, %v667_v40  ;;  %v672_v45 = vsub.f32 0.0, %v668_v41  ;;  %v673_v46 = vsub.f32 0.0, %v669_v42  ;;  %v674_v47 = vsub.f32 0.0, %v670_v43 }
 0x1b4   : > { %v675_v48 = vmul.f32 1.442695, %v671_v44  ;;  %v677_v49 = vmul.f32 1.442695, %v672_v45  ;;  %v679_v50 = vmul.f32 1.442695, %v673_v46 }
 0x1b5   : > { %v681_v51 = vmul.f32 1.442695, %v674_v47 }
 0x1b6   : > { %1019 = vpow2.f32 %v675_v48 }
 0x1b7   : > { %1021 = vpow2.f32 %v677_v49 }
 0x1b8   : > { %1023 = vpow2.f32 %v679_v50 }
 0x1b9   : > { %1025 = vpow2.f32 %v681_v51 }
 0x1c0   : > { %v1020_v52 = vpop.eup %1019 }
 0x1c1   : > { %v1022_v53 = vpop.eup %1021  ;;  %v683_v54 = vadd.f32 1.0, %v1020_v52 }
 0x1c2   : > { %v1024_v55 = vpop.eup %1023  ;;  %v684_v56 = vadd.f32 1.0, %v1022_v53 }
 0x1c3   : > { %v1026_v57 = vpop.eup %1025  ;;  %v685_v58 = vadd.f32 1.0, %v1024_v55  ;;  %1027 = vrcp.f32 %v683_v54 }
 0x1c4   : > { %v686_v59 = vadd.f32 1.0, %v1026_v57  ;;  %1029 = vrcp.f32 %v684_v56 }
 0x1c5   : > { %1031 = vrcp.f32 %v685_v58 }
 0x1c6   : > { %1033 = vrcp.f32 %v686_v59 }
 0x1cd   : > { %v1028_v60 = vpop.eup %1027 }
 0x1ce   : > { %v1030_v61 = vpop.eup %1029  ;;  %v691_v62 = vmul.f32 %v1028_v60, %v667_v40 }
 0x1cf   : > { %v1032_v63 = vpop.eup %1031  ;;  %v692_v0 = vmul.f32 %v1030_v61, %v668_v41 }
 0x1d0   : > { %v1034_v1 = vpop.eup %1033  ;;  %v693_v2 = vmul.f32 %v1032_v63, %v669_v42  ;;  %695 = vst [vmem:[%s283_s12] sm:$0xff] %v691_v62 }
 0x1d1   : > { %v694_v3 = vmul.f32 %v1034_v1, %v670_v43  ;;  %696 = vst [vmem:[%s283_s12 + $0x8] sm:$0xff] %v692_v0 }
 0x1d2   : > { %697 = vst [vmem:[%s283_s12 + $0x10] sm:$0xff] %v693_v2 }
 0x1d3   : > { %698 = vst [vmem:[%s283_s12 + $0x18] sm:$0xff] %v694_v3 }
 0x1d4   : > { %1106 = shalt.err (!%p1103_p0)
}
 0x1d5   : > { %s1107_s22 = scalar_lea.hbm %s1434_s14, 512  ;;  %s1111_s10 = scalar_lea.hbm %s1487_s4, 1024 }
 0x1d6   : > { %p1108_p2 = scmp.ne.s32.totalorder %s1434_s14, %s1107_s22  ;;  %p1112_p5 = scmp.lt.u32.totalorder %s1434_s14, %s1487_s4 }
 0x1d7   : > { %p1113_p10 = scmp.lt.u32.totalorder %s1111_s10, %s1107_s22  ;;  %p1115_p11 = scmp.lt.u32.totalorder %s1107_s22, %s1434_s14 }
 0x1d8   : > { %p1109_p7 = pnand %p1108_p2, %p1510_p13 }
 0x1d9   : > { %p1114_p9 = por %p1113_p10, %p1112_p5 }
 0x1da   : > { %p1110_p12 = pneg %p1109_p7 }
 0x1db   : > { %p1116_p4 = por %p1115_p11, %p1114_p9 }
 0x1dd   : > { %p1117_p1 = pnand %p1116_p4, %p1110_p12 }
 0x1df   : > { %1120 = shalt.err (!%p1117_p1)
}
 0x1e0   : > { %s1188_s13 = smov 256   ;;  %s1189_s5 = smov 512  }
 0x1e1   : > { %s1190_s6 = smov 16  }
 0x1e2   : > { %890 = dma.vmem_to_hbm [thread:$0]  (%p1510_p13), %s1429_s24, 512, %s1434_s14, %s700_s18, %s1188_s13, %s1189_s5, %s1190_s6  }
 0x1e3 PF: > { %s728_s9 = sand.u32 1, %s1159_s15   ;;  %p1511_p3 = scmp.ne.s32.totalorder %s1500_s27, 0 }
 0x1e4   : > { %p1512_p6 = scmp.ge.s32.totalorder %s1179_s20, 2  ;;  %s729_s23 = scalar_lea.sflag [#allocation5], %s728_s9 }
 0x1e6   : > { %p901_p8 = pnand %p1512_p6, %p1511_p3 }
 0x1e8   : > { %1154 = dma.done.wait (!%p901_p8), %s729_s23, 512  }
 0x1e9   : > { %1156 = vsyncadd (!%p901_p8), %s729_s23, 4294966784  ;;  %s21_s20 = sadd.s32 1, %s1179_s20   ;;  %s1513_s15 = smov %s1163_s16 }
 0x1ea   : > { %p18_p0 = scmp.ge.s32.totalorder %s21_s20, 4   ;;  %s1514_s16 = smov %s1167_s17 }
 0x1eb   : > { %s1515_s17 = smov %s1337_s8  ;;  %s1516_s18 = smov %s1175_s19 }
 0x1ec   : > { %s1517_s19 = smov %s1519_s7  ;;  %20 = sbr.rel (!%p18_p0) target bundleno = 7 (0x7), region = 105 }
 0x1f3   :  { %734 = vsyncpa [#allocation4], 1 }
 0x1f4   :  { %736 = vsyncpa [#allocation4 + $0x1], 1 }
 0x1f5   :  { %737 = vsyncpa [#allocation7], 1 }
 0x1f6   :  { %739 = vsyncpa [#allocation7 + $0x1], 1 }
 0x1f7   :  { %740 = vsyncpa [#allocation5], 1 }
 0x1f8   :  { %742 = vsyncpa [#allocation5 + $0x1], 1 }

</bundles_post_ra>
